<compile_context>
chip_gen: v6e
topology: v6e:2x2x1
jax: 0.10.0
libtpu: 0.0.40
codegen_flags: <defaults>
</compile_context>

<pallas_src>
import jax
import jax.numpy as jnp
from jax.experimental import pallas as pl
from jax.experimental.pallas import tpu as pltpu


def _round_up(x, mult):
    return ((x + mult - 1) // mult) * mult


def _vmem_capacity_bytes():
    """Per-TensorCore VMEM capacity, generation-aware with a safe fallback."""
    try:
        info = pltpu.get_tpu_info()
        cap = getattr(info, "vmem_capacity_bytes", None)
        if cap:
            return int(cap)
    except Exception:
        pass
    kind = ""
    try:
        kind = jax.devices()[0].device_kind.lower()
    except Exception:
        pass
    if "v7" in kind or "7x" in kind:
        return 64 * 1024 * 1024
    return 128 * 1024 * 1024


def _cores_per_chip():
    """TensorCores per chip (dual-TC parts want >= 2 grid steps on the parallel axis)."""
    try:
        kind = jax.devices()[0].device_kind.lower()
    except Exception:
        return 1
    if "v7" in kind or "7x" in kind or "v4" in kind or "v5p" in kind:
        return 2
    return 1


def _comp_kernel(shared_ref, spec_ref, w0_ref, w1_ref, out_ref):
    s = shared_ref[...]
    # Native [M,K]@[K,N] MXU path (weight halves pre-transposed in the wrapper).
    acc = jnp.dot(s, w0_ref[...], preferred_element_type=jnp.float32)
    acc = acc + jnp.dot(spec_ref[...], w1_ref[...], preferred_element_type=jnp.float32)
    # Residual in f32, single cast back at the store.
    out_ref[...] = (s.astype(jnp.float32) + acc).astype(out_ref.dtype)


def compositional_layer(shared_ft, spec_ft, weight, *, tm_max=2048):
    """shared_ft, spec_ft: (..., in_dim). weight: (out_dim, 2*in_dim) (PyTorch layout)."""
    in_dim = shared_ft.shape[-1]
    out_dim, two_in = weight.shape
    assert spec_ft.shape == shared_ft.shape, "shared/spec shapes must match"
    assert two_in == 2 * in_dim, "weight must be (out_dim, 2*in_dim)"
    assert out_dim == in_dim, "residual add requires out_dim == in_dim"

    lead_shape = shared_ft.shape[:-1]
    m = 1
    for d in lead_shape:
        m *= d

    s2 = shared_ft.reshape(m, in_dim)
    p2 = spec_ft.reshape(m, in_dim)

    # One-time split + transpose of the weight in the wrapper -> (K, N) halves.
    w_t = weight.T                       # (2*in_dim, out_dim)
    w0 = w_t[:in_dim]                    # (in_dim, out_dim)
    w1 = w_t[in_dim:]                    # (in_dim, out_dim)

    # Lane-dense guard: pad feature dims to a multiple of 128 so stores are unmasked.
    # (Zero-padded K rows / N cols of the weight contribute exactly zero.)
    d_pad = _round_up(in_dim, 128)
    feat_pad = d_pad - in_dim
    if feat_pad:
        s2 = jnp.pad(s2, ((0, 0), (0, feat_pad)))
        p2 = jnp.pad(p2, ((0, 0), (0, feat_pad)))
        w0 = jnp.pad(w0, ((0, feat_pad), (0, feat_pad)))
        w1 = jnp.pad(w1, ((0, feat_pad), (0, feat_pad)))
    in_dim_p = out_dim_p = d_pad

    act_bytes = jnp.dtype(shared_ft.dtype).itemsize
    w_bytes = 2 * in_dim_p * out_dim_p * jnp.dtype(weight.dtype).itemsize

    # Sublane packing granularity: f32 -> 8 rows/vreg, bf16 -> 16, int8/fp8 -> 32.
    sub = {4: 8, 2: 16, 1: 32}.get(act_bytes, 8)

    # Generation-aware VMEM budget: ~96 MiB on 128 MiB parts (v5e/v6e), ~48 MiB on v7x,
    # leaving headroom for compiler scratch / semaphores / pipeline bookkeeping.
    cap = _vmem_capacity_bytes()
    budget = (cap * 3) // 4

    # The weight halves are fetched once (constant index_map); single-buffer them when
    # they are large enough to matter so they do not eat row-tile VMEM.
    weight_single_buffer = w_bytes > (4 << 20)
    w_buf_count = 1 if weight_single_buffer else 2

    avail = budget - w_buf_count * w_bytes - (2 << 20)
    if avail <= 0:
        # TODO(synk): add an out_dim (N) grid axis for weights that do not fit VMEM
        # (relevant on v7x's 64 MiB for large hidden sizes).
        raise ValueError(
            f"weight ({w_bytes} B x{w_buf_count} buffers) exceeds the VMEM budget "
            f"({budget} B); N-tiling not implemented")

    def _fit_tm(depth):
        # 2 streamed inputs at `depth` buffers + 1 output at the default 2 buffers.
        per_row = (2 * depth * in_dim_p + 2 * out_dim_p) * act_bytes
        return max(sub, ((avail // per_row) // sub) * sub)

    # Prefer 3-deep activation buffering when it still allows a roofline-sized tile.
    act_depth = 3
    tm = _fit_tm(3)
    if tm < 256:
        act_depth = 2
        tm = _fit_tm(2)

    tm = min(tm, tm_max, _round_up(m, sub))
    # Keep both TensorCores busy on dual-TC chips (v7x): at least `cores` grid steps.
    cores = _cores_per_chip()
    if cores > 1 and m > sub:
        tm = min(tm, _round_up(pl.cdiv(m, cores), sub))
    tm = max(sub, (tm // sub) * sub)

    steps = pl.cdiv(m, tm)   # ragged last tile handled by Pallas masking (no jnp.pad)
    grid = (steps,)

    act_mode = pl.Buffered(act_depth) if (act_depth > 2 and steps >= act_depth) else None
    w_mode = pl.Buffered(1) if weight_single_buffer else None

    def _spec(shape, index_map, mode):
        if mode is None:
            return pl.BlockSpec(shape, index_map)
        return pl.BlockSpec(shape, index_map, pipeline_mode=mode)

    cost = pl.CostEstimate(
        flops=2 * m * (2 * in_dim_p) * out_dim_p + m * out_dim_p,
        transcendentals=0,
        bytes_accessed=(2 * m * in_dim_p + m * out_dim_p) * act_bytes + w_bytes,
    )

    out2 = pl.pallas_call(
        _comp_kernel,
        out_shape=jax.ShapeDtypeStruct((m, out_dim_p), shared_ft.dtype),
        grid=grid,
        in_specs=[
            _spec((tm, in_dim_p), lambda i: (i, 0), act_mode),       # shared rows
            _spec((tm, in_dim_p), lambda i: (i, 0), act_mode),       # spec rows
            _spec((in_dim_p, out_dim_p), lambda i: (0, 0), w_mode),  # W0 (resident)
            _spec((in_dim_p, out_dim_p), lambda i: (0, 0), w_mode),  # W1 (resident)
        ],
        out_specs=pl.BlockSpec((tm, out_dim_p), lambda i: (i, 0)),
        compiler_params=pltpu.CompilerParams(
            dimension_semantics=("parallel",),   # shard M tiles across v7x's 2 TCs
            vmem_limit_bytes=int(budget),
        ),
        cost_estimate=cost,
    )(s2, p2, w0, w1)

    if feat_pad:
        out2 = out2[:, :out_dim]
    return out2.reshape(*lead_shape, out_dim)


def _reference(shared_ft, spec_ft, weight):
    cat = jnp.concatenate([shared_ft, spec_ft], axis=-1)
    out = cat @ weight.T
    return shared_ft + out


if __name__ == "__main__":
    key = jax.random.PRNGKey(0)

    # --- default module config: in_dim = out_dim = 256 (lane-dense), small batch/seq ---
    in_dim = 256
    out_dim = 256
    batch, seq = 2, 8

    k_s, k_p, k_w, k2 = jax.random.split(key, 4)
    shared_ft = jax.random.normal(k_s, (batch, seq, in_dim), dtype=jnp.float32)
    spec_ft = jax.random.normal(k_p, (batch, seq, in_dim), dtype=jnp.float32)
    bound = 1.0 / jnp.sqrt(2.0 * in_dim)   # torch Linear default init range
    weight = jax.random.uniform(
        k_w, (out_dim, 2 * in_dim), dtype=jnp.float32, minval=-bound, maxval=bound)

    # f32 path
    out = jax.block_until_ready(compositional_layer(shared_ft, spec_ft, weight))
    ref = _reference(shared_ft, spec_ft, weight)
    assert out.shape == ref.shape
    assert jnp.allclose(out, ref, atol=1e-4, rtol=1e-4), "f32 mismatch vs reference"

    # bf16 path (recommended on v5e/v6e/v7x: halves HBM traffic on a mem-bound kernel;
    # accumulation and residual stay f32 inside the kernel).
    out_bf16 = jax.block_until_ready(
        compositional_layer(
            shared_ft.astype(jnp.bfloat16),
            spec_ft.astype(jnp.bfloat16),
            weight.astype(jnp.bfloat16)))
    assert out_bf16.dtype == jnp.bfloat16
    assert jnp.allclose(out_bf16.astype(jnp.float32), ref, atol=2e-2, rtol=2e-2), \
        "bf16 mismatch vs f32 reference"

    # --- lane-sparse config (in_dim not a multiple of 128) exercises the pad-to-128 guard ---
    in_dim2 = 96
    k_s2, k_p2, k_w2 = jax.random.split(k2, 3)
    s_small = jax.random.normal(k_s2, (batch, seq, in_dim2), dtype=jnp.float32)
    p_small = jax.random.normal(k_p2, (batch, seq, in_dim2), dtype=jnp.float32)
    w_small = jax.random.uniform(
        k_w2, (in_dim2, 2 * in_dim2), dtype=jnp.float32, minval=-0.05, maxval=0.05)
    out_small = jax.block_until_ready(compositional_layer(s_small, p_small, w_small))
    ref_small = _reference(s_small, p_small, w_small)
    assert jnp.allclose(out_small, ref_small, atol=1e-4, rtol=1e-4), \
        "lane-sparse (padded) config mismatch vs reference"

    print("KERNEL_OK")
</pallas_src>

<mosaic_0001>
module attributes {stable_mosaic.version = 11 : i64} {
  func.func @_comp_kernel(%arg0: i32, %arg1: memref<16x256xf32, #tpu.memory_space<vmem>>, %arg2: memref<16x256xf32, #tpu.memory_space<vmem>>, %arg3: memref<256x256xf32, #tpu.memory_space<vmem>>, %arg4: memref<256x256xf32, #tpu.memory_space<vmem>>, %arg5: memref<16x256xf32, #tpu.memory_space<vmem>>) attributes {dimension_semantics = [#tpu.dimension_semantics<parallel>], iteration_bounds = array<i64: 1>, scalar_prefetch = 0 : i64, scratch_operands = 0 : i64, tpu.core_type = #tpu.core_type<tc>, window_params = [{transform_indices = @transform_0, window_bounds = array<i64: 16, 256>}, {transform_indices = @transform_1, window_bounds = array<i64: 16, 256>}, {pipeline_mode = #tpu.pipeline_mode<synchronous>, transform_indices = @transform_2, window_bounds = array<i64: 256, 256>}, {pipeline_mode = #tpu.pipeline_mode<synchronous>, transform_indices = @transform_3, window_bounds = array<i64: 256, 256>}, {transform_indices = @transform_4, window_bounds = array<i64: 16, 256>}]} {
    %c0 = arith.constant 0 : index
    %c0_0 = arith.constant 0 : index
    %0 = vector.load %arg1[%c0, %c0_0] : memref<16x256xf32, #tpu.memory_space<vmem>>, vector<16x256xf32>
    %c0_1 = arith.constant 0 : index
    %c0_2 = arith.constant 0 : index
    %1 = vector.load %arg3[%c0_1, %c0_2] : memref<256x256xf32, #tpu.memory_space<vmem>>, vector<256x256xf32>
    %cst = arith.constant dense<0.000000e+00> : vector<16x256xf32>
    %2 = tpu.matmul %0, %1, %cst {dimension_numbers = #tpu.dot_dimension_numbers<[1], [0], [0], [1], [0, 0, 1, 1], [], []>} : vector<16x256xf32>, vector<256x256xf32>, vector<16x256xf32> -> vector<16x256xf32>
    %c0_3 = arith.constant 0 : index
    %c0_4 = arith.constant 0 : index
    %3 = vector.load %arg2[%c0_3, %c0_4] : memref<16x256xf32, #tpu.memory_space<vmem>>, vector<16x256xf32>
    %c0_5 = arith.constant 0 : index
    %c0_6 = arith.constant 0 : index
    %4 = vector.load %arg4[%c0_5, %c0_6] : memref<256x256xf32, #tpu.memory_space<vmem>>, vector<256x256xf32>
    %cst_7 = arith.constant dense<0.000000e+00> : vector<16x256xf32>
    %5 = tpu.matmul %3, %4, %cst_7 {dimension_numbers = #tpu.dot_dimension_numbers<[1], [0], [0], [1], [0, 0, 1, 1], [], []>} : vector<16x256xf32>, vector<256x256xf32>, vector<16x256xf32> -> vector<16x256xf32>
    %6 = arith.addf %2, %5 : vector<16x256xf32>
    %7 = arith.addf %0, %6 : vector<16x256xf32>
    %c0_8 = arith.constant 0 : index
    %c0_9 = arith.constant 0 : index
    %8 = vector.load %arg5[%c0_8, %c0_9] : memref<16x256xf32, #tpu.memory_space<vmem>>, vector<16x256xf32>
    tpu.vector_store %arg5[%c0_8, %c0_9], %7 {strides = array<i32>} : memref<16x256xf32, #tpu.memory_space<vmem>>, vector<16x256xf32>,
    return
  }
  func.func @transform_0(%arg0: i32) -> (i32, i32) {
    %c0_i32 = arith.constant 0 : i32
    %c0_i32_0 = arith.constant 0 : i32
    return %arg0, %c0_i32 : i32, i32
  }
  func.func @transform_1(%arg0: i32) -> (i32, i32) {
    %c0_i32 = arith.constant 0 : i32
    %c0_i32_0 = arith.constant 0 : i32
    return %arg0, %c0_i32 : i32, i32
  }
  func.func @transform_2(%arg0: i32) -> (i32, i32) {
    %c0_i32 = arith.constant 0 : i32
    %c0_i32_0 = arith.constant 0 : i32
    %c0_i32_1 = arith.constant 0 : i32
    return %c0_i32, %c0_i32_0 : i32, i32
  }
  func.func @transform_3(%arg0: i32) -> (i32, i32) {
    %c0_i32 = arith.constant 0 : i32
    %c0_i32_0 = arith.constant 0 : i32
    %c0_i32_1 = arith.constant 0 : i32
    return %c0_i32, %c0_i32_0 : i32, i32
  }
  func.func @transform_4(%arg0: i32) -> (i32, i32) {
    %c0_i32 = arith.constant 0 : i32
    %c0_i32_0 = arith.constant 0 : i32
    return %arg0, %c0_i32 : i32, i32
  }
}

</mosaic_0001>

<bundles_post_ra>
// kernel: tpu_custom_call.1
= control target key start
LH: loop header
LB: loop body
LE: loop exit
PB: predicated region body
PF: predicated region fallthrough
CT: control target
= control target key end

     0   :  { %9 = vsyncpa [#allocation3], 0  ;;  %s567_s0 = inlined_call_operand.hbm [shape: f32[16,256], index: 0, kind: input, shape index: {}]   ;;  %s568_s1 = inlined_call_operand.hbm [shape: f32[16,256], index: 1, kind: input, shape index: {}]   ;;  %s569_s2 = inlined_call_operand.hbm [shape: f32[256,256], index: 2, kind: input, shape index: {}]   ;;  %s570_s3 = inlined_call_operand.hbm [shape: f32[256,256], index: 3, kind: input, shape index: {}]   ;;  %s571_s4 = inlined_call_operand.hbm [shape: f32[16,256], index: 4, kind: output, shape index: {}]  }
   0x1   :  { %10 = vsyncpa [#allocation6], 0 }
   0x2   :  { %11 = vsyncpa [#allocation9], 0 }
   0x3   :  { %12 = vsyncpa [#allocation4], 0  ;;  %s505_s15 = smov [#allocation5]   ;;  %s506_s17 = smov [#allocation2]  }
   0x4   :  { %s30_s16 = sshll.u32 %s505_s15, 4  ;;  %s18_s18 = sshll.u32 %s506_s17, 4  ;;  %s31_s16 = int_to_ptr.vmem [resolvable:$true] %s30_s16  ;;  %s19_s18 = int_to_ptr.vmem [resolvable:$true] %s18_s18 }
   0x5   :  { %s405_s19 = scalar_lea.vmem %s31_s16, 512  ;;  %p410_p1 = scmp.lt.s32.totalorder %s31_s16, %s31_s16 }
   0x6   :  { %p406_p0 = scmp.ne.s32.totalorder %s31_s16, %s405_s19  ;;  %p411_p2 = scmp.lt.s32.totalorder %s405_s19, %s405_s19 }
   0x8   :  { %p412_p3 = por %p411_p2, %p410_p1 }
   0xa   :  { %p413_p4 = pnand %p412_p3, %p406_p0 }
   0xc   :  { %416 = shalt.err (!%p413_p4)
}
   0xd   :  { %s507_s20 = smov 256   ;;  %s508_s21 = smov 16  }
   0xe   :  { %36 = dma.hbm_to_vmem [thread:$0]  %s568_s1, 512, %s31_s16, [#allocation6], %s507_s20, %s507_s20, %s508_s21  }
   0xf   :  { %s425_s24 = scalar_lea.vmem %s19_s18, 512  ;;  %p430_p6 = scmp.lt.s32.totalorder %s19_s18, %s19_s18 }
  0x10   :  { %p426_p5 = scmp.ne.s32.totalorder %s19_s18, %s425_s24  ;;  %p431_p7 = scmp.lt.s32.totalorder %s425_s24, %s425_s24 }
  0x12   :  { %p432_p8 = por %p431_p7, %p430_p6 }
  0x14   :  { %p433_p9 = pnand %p432_p8, %p426_p5 }
  0x16   :  { %436 = shalt.err (!%p433_p9)
}
  0x17   :  { %24 = dma.hbm_to_vmem [thread:$0]  %s567_s0, 512, %s19_s18, [#allocation3], %s507_s20, %s507_s20, %s508_s21  }
  0x18   :  { %s509_s27 = smov [#allocation7]   ;;  %s510_s29 = smov [#allocation8]  }
  0x19   :  { %s42_s28 = sshll.u32 %s509_s27, 4  ;;  %s54_s30 = sshll.u32 %s510_s29, 4  ;;  %s43_s28 = int_to_ptr.vmem [resolvable:$true] %s42_s28  ;;  %s55_s30 = int_to_ptr.vmem [resolvable:$true] %s54_s30 }
  0x1a   :  { %s445_s1 = scalar_lea.vmem %s43_s28, 8192  ;;  %p450_p11 = scmp.lt.s32.totalorder %s43_s28, %s43_s28 }
  0x1b   :  { %p446_p10 = scmp.ne.s32.totalorder %s43_s28, %s445_s1  ;;  %p451_p12 = scmp.lt.s32.totalorder %s445_s1, %s445_s1 }
  0x1d   :  { %p452_p13 = por %p451_p12, %p450_p11 }
  0x1f   :  { %p453_p0 = pnand %p452_p13, %p446_p10 }
  0x21   :  { %456 = shalt.err (!%p453_p0)
}
  0x22   :  { %48 = dma.hbm_to_vmem [thread:$0]  %s569_s2, 8192, %s43_s28, [#allocation6], %s507_s20, %s507_s20, %s508_s21  }
  0x23   :  { %s465_s0 = scalar_lea.vmem %s55_s30, 8192  ;;  %p470_p2 = scmp.lt.s32.totalorder %s55_s30, %s55_s30 }
  0x24   :  { %p466_p1 = scmp.ne.s32.totalorder %s55_s30, %s465_s0  ;;  %p471_p3 = scmp.lt.s32.totalorder %s465_s0, %s465_s0 }
  0x26   :  { %p472_p4 = por %p471_p3, %p470_p2 }
  0x28   :  { %p473_p5 = pnand %p472_p4, %p466_p1 }
  0x2a   :  { %476 = shalt.err (!%p473_p5)
}
  0x2b   :  { %60 = dma.hbm_to_vmem [thread:$0]  %s570_s3, 8192, %s55_s30, [#allocation9], %s507_s20, %s507_s20, %s508_s21  }
  0x2c   :  { %497 = dma.done.wait [#allocation3], 512  }
  0x2d   :  { %498 = vsyncadd [#allocation3], 4294966784 }
  0x2e   :  { %499 = dma.done.wait [#allocation6], 8704  }
  0x2f   :  { %500 = vsyncadd [#allocation6], 4294958592 }
  0x30   :  { %501 = dma.done.wait [#allocation9], 8192  }
  0x31   :  { %502 = vsyncadd [#allocation9], 4294959104  ;;  %v176_v0 = vld [vmem:[#allocation8 + $0xf8] sm:$0xff]  ;;  %v175_v2 = vld [vmem:[#allocation8 + $0xf0] sm:$0xff]  ;;  %s511_s2 = smov [#allocation10]  }
  0x32   :  { %v108_v1 = vld [vmem:[#allocation7 + $0xf8] sm:$0xff]  ;;  %209 = vmatprep.subr.mxu0 %v176_v0  ;;  %v107_v3 = vld [vmem:[#allocation7 + $0xf0] sm:$0xff]  ;;  %v174_v4 = vld [vmem:[#allocation8 + $0xe8] sm:$0xff]  ;;  %s376_s3 = sshll.u32 %s511_s2, 4  ;;  %s377_s3 = int_to_ptr.vmem [resolvable:$true] %s376_s3 }
  0x33   :  { %286 = vmatprep.subr.mxu1 %v108_v1  ;;  %v106_v5 = vld [vmem:[#allocation7 + $0xe8] sm:$0xff]  ;;  %210 = vmatpush1.msra.mxu0 %v175_v2  ;;  %v173_v6 = vld [vmem:[#allocation8 + $0xe0] sm:$0xff]  ;;  %v172_v8 = vld [vmem:[#allocation8 + $0xd8] sm:$0xff]  ;;  %s477_s9 = scalar_lea.vmem %s377_s3, 512  ;;  %p482_p7 = scmp.lt.s32.totalorder %s377_s3, %s377_s3 }
  0x34   :  { %287 = vmatpush1.msra.mxu1 %v107_v3  ;;  %v105_v7 = vld [vmem:[#allocation7 + $0xe0] sm:$0xff]  ;;  %211 = vmatprep.subr.mxu0 %v174_v4  ;;  %v104_v9 = vld [vmem:[#allocation7 + $0xd8] sm:$0xff]  ;;  %v171_v10 = vld [vmem:[#allocation8 + $0xd0] sm:$0xff]  ;;  %p478_p6 = scmp.ne.s32.totalorder %s377_s3, %s477_s9  ;;  %p483_p8 = scmp.lt.s32.totalorder %s477_s9, %s477_s9 }
  0x35   :  { %288 = vmatprep.subr.mxu1 %v106_v5  ;;  %v103_v11 = vld [vmem:[#allocation7 + $0xd0] sm:$0xff]  ;;  %212 = vmatpush1.msra.mxu0 %v173_v6  ;;  %v170_v12 = vld [vmem:[#allocation8 + $0xc8] sm:$0xff]  ;;  %v169_v14 = vld [vmem:[#allocation8 + $0xc0] sm:$0xff] }
  0x36   :  { %289 = vmatpush1.msra.mxu1 %v105_v7  ;;  %v102_v13 = vld [vmem:[#allocation7 + $0xc8] sm:$0xff]  ;;  %213 = vmatprep.subr.mxu0 %v172_v8  ;;  %v101_v15 = vld [vmem:[#allocation7 + $0xc0] sm:$0xff]  ;;  %v168_v16 = vld [vmem:[#allocation8 + $0xb8] sm:$0xff]  ;;  %p484_p9 = por %p483_p8, %p482_p7 }
  0x37   :  { %290 = vmatprep.subr.mxu1 %v104_v9  ;;  %214 = vmatpush1.msra.mxu0 %v171_v10  ;;  %v100_v17 = vld [vmem:[#allocation7 + $0xb8] sm:$0xff]  ;;  %v167_v18 = vld [vmem:[#allocation8 + $0xb0] sm:$0xff]  ;;  %v166_v20 = vld [vmem:[#allocation8 + $0xa8] sm:$0xff] }
  0x38   :  { %291 = vmatpush1.msra.mxu1 %v103_v11  ;;  %215 = vmatprep.subr.mxu0 %v170_v12  ;;  %v99_v19 = vld [vmem:[#allocation7 + $0xb0] sm:$0xff]  ;;  %v98_v21 = vld [vmem:[#allocation7 + $0xa8] sm:$0xff]  ;;  %v165_v22 = vld [vmem:[#allocation8 + $0xa0] sm:$0xff]  ;;  %p485_p10 = pnand %p484_p9, %p478_p6 }
  0x39   :  { %292 = vmatprep.subr.mxu1 %v102_v13  ;;  %216 = vmatpush1.msra.mxu0 %v169_v14  ;;  %v97_v23 = vld [vmem:[#allocation7 + $0xa0] sm:$0xff]  ;;  %v164_v24 = vld [vmem:[#allocation8 + $0x98] sm:$0xff]  ;;  %v163_v26 = vld [vmem:[#allocation8 + $0x90] sm:$0xff] }
  0x3a   :  { %293 = vmatpush1.msra.mxu1 %v101_v15  ;;  %217 = vmatprep.subr.mxu0 %v168_v16  ;;  %v96_v25 = vld [vmem:[#allocation7 + $0x98] sm:$0xff]  ;;  %v95_v27 = vld [vmem:[#allocation7 + $0x90] sm:$0xff]  ;;  %v162_v28 = vld [vmem:[#allocation8 + $0x88] sm:$0xff] }
  0x3b   :  { %294 = vmatprep.subr.mxu1 %v100_v17  ;;  %218 = vmatpush1.msra.mxu0 %v167_v18  ;;  %v94_v29 = vld [vmem:[#allocation7 + $0x88] sm:$0xff]  ;;  %v161_v30 = vld [vmem:[#allocation8 + $0x80] sm:$0xff]  ;;  %v160_v32 = vld [vmem:[#allocation8 + $0x78] sm:$0xff] }
  0x3c   :  { %295 = vmatpush1.msra.mxu1 %v99_v19  ;;  %219 = vmatprep.subr.mxu0 %v166_v20  ;;  %v93_v31 = vld [vmem:[#allocation7 + $0x80] sm:$0xff]  ;;  %v92_v33 = vld [vmem:[#allocation7 + $0x78] sm:$0xff]  ;;  %v159_v34 = vld [vmem:[#allocation8 + $0x70] sm:$0xff] }
  0x3d   :  { %296 = vmatprep.subr.mxu1 %v98_v21  ;;  %220 = vmatpush1.msra.mxu0 %v165_v22  ;;  %v91_v35 = vld [vmem:[#allocation7 + $0x70] sm:$0xff]  ;;  %v158_v36 = vld [vmem:[#allocation8 + $0x68] sm:$0xff]  ;;  %v157_v38 = vld [vmem:[#allocation8 + $0x60] sm:$0xff] }
  0x3e   :  { %297 = vmatpush1.msra.mxu1 %v97_v23  ;;  %221 = vmatprep.subr.mxu0 %v164_v24  ;;  %v90_v37 = vld [vmem:[#allocation7 + $0x68] sm:$0xff]  ;;  %v89_v39 = vld [vmem:[#allocation7 + $0x60] sm:$0xff]  ;;  %v156_v40 = vld [vmem:[#allocation8 + $0x58] sm:$0xff] }
  0x3f   :  { %298 = vmatprep.subr.mxu1 %v96_v25  ;;  %222 = vmatpush1.msra.mxu0 %v163_v26  ;;  %v88_v41 = vld [vmem:[#allocation7 + $0x58] sm:$0xff]  ;;  %v155_v42 = vld [vmem:[#allocation8 + $0x50] sm:$0xff]  ;;  %v154_v44 = vld [vmem:[#allocation8 + $0x48] sm:$0xff] }
  0x40   :  { %299 = vmatpush1.msra.mxu1 %v95_v27  ;;  %223 = vmatprep.subr.mxu0 %v162_v28  ;;  %v87_v43 = vld [vmem:[#allocation7 + $0x50] sm:$0xff]  ;;  %v86_v45 = vld [vmem:[#allocation7 + $0x48] sm:$0xff]  ;;  %v153_v46 = vld [vmem:[#allocation8 + $0x40] sm:$0xff] }
  0x41   :  { %300 = vmatprep.subr.mxu1 %v94_v29  ;;  %224 = vmatpush1.msra.mxu0 %v161_v30  ;;  %v85_v47 = vld [vmem:[#allocation7 + $0x40] sm:$0xff]  ;;  %v152_v48 = vld [vmem:[#allocation8 + $0x38] sm:$0xff]  ;;  %v151_v50 = vld [vmem:[#allocation8 + $0x30] sm:$0xff] }
  0x42   :  { %301 = vmatpush1.msra.mxu1 %v93_v31  ;;  %225 = vmatprep.subr.mxu0 %v160_v32  ;;  %v84_v49 = vld [vmem:[#allocation7 + $0x38] sm:$0xff]  ;;  %v83_v51 = vld [vmem:[#allocation7 + $0x30] sm:$0xff]  ;;  %v150_v52 = vld [vmem:[#allocation8 + $0x28] sm:$0xff] }
  0x43   :  { %302 = vmatprep.subr.mxu1 %v92_v33  ;;  %226 = vmatpush1.msra.mxu0 %v159_v34  ;;  %v82_v53 = vld [vmem:[#allocation7 + $0x28] sm:$0xff]  ;;  %v149_v54 = vld [vmem:[#allocation8 + $0x20] sm:$0xff]  ;;  %v148_v56 = vld [vmem:[#allocation8 + $0x18] sm:$0xff] }
  0x44   :  { %303 = vmatpush1.msra.mxu1 %v91_v35  ;;  %227 = vmatprep.subr.mxu0 %v158_v36  ;;  %v81_v55 = vld [vmem:[#allocation7 + $0x20] sm:$0xff]  ;;  %v80_v57 = vld [vmem:[#allocation7 + $0x18] sm:$0xff]  ;;  %v147_v58 = vld [vmem:[#allocation8 + $0x10] sm:$0xff] }
  0x45   :  { %304 = vmatprep.subr.mxu1 %v90_v37  ;;  %228 = vmatpush1.msra.mxu0 %v157_v38  ;;  %v79_v59 = vld [vmem:[#allocation7 + $0x10] sm:$0xff]  ;;  %v146_v60 = vld [vmem:[#allocation8 + $0x8] sm:$0xff]  ;;  %v145_v62 = vld [vmem:[#allocation8] sm:$0xff] }
  0x46   :  { %305 = vmatpush1.msra.mxu1 %v89_v39  ;;  %229 = vmatprep.subr.mxu0 %v156_v40  ;;  %v78_v61 = vld [vmem:[#allocation7 + $0x8] sm:$0xff]  ;;  %v77_v63 = vld [vmem:[#allocation7] sm:$0xff]  ;;  %v208_v0 = vld [vmem:[#allocation8 + $0x1f8] sm:$0xff] }
  0x47   :  { %306 = vmatprep.subr.mxu1 %v88_v41  ;;  %230 = vmatpush1.msra.mxu0 %v155_v42  ;;  %v140_v1 = vld [vmem:[#allocation7 + $0x1f8] sm:$0xff]  ;;  %v207_v2 = vld [vmem:[#allocation8 + $0x1f0] sm:$0xff]  ;;  %v206_v4 = vld [vmem:[#allocation8 + $0x1e8] sm:$0xff] }
  0x48   :  { %307 = vmatpush1.msra.mxu1 %v87_v43  ;;  %231 = vmatprep.subr.mxu0 %v154_v44  ;;  %v139_v3 = vld [vmem:[#allocation7 + $0x1f0] sm:$0xff]  ;;  %v138_v5 = vld [vmem:[#allocation7 + $0x1e8] sm:$0xff]  ;;  %v205_v6 = vld [vmem:[#allocation8 + $0x1e0] sm:$0xff] }
  0x49   :  { %308 = vmatprep.subr.mxu1 %v86_v45  ;;  %232 = vmatpush1.msra.mxu0 %v153_v46  ;;  %v137_v7 = vld [vmem:[#allocation7 + $0x1e0] sm:$0xff]  ;;  %v204_v8 = vld [vmem:[#allocation8 + $0x1d8] sm:$0xff]  ;;  %v203_v10 = vld [vmem:[#allocation8 + $0x1d0] sm:$0xff] }
  0x4a   :  { %309 = vmatpush1.msra.mxu1 %v85_v47  ;;  %233 = vmatprep.subr.mxu0 %v152_v48  ;;  %v136_v9 = vld [vmem:[#allocation7 + $0x1d8] sm:$0xff]  ;;  %v135_v11 = vld [vmem:[#allocation7 + $0x1d0] sm:$0xff]  ;;  %v202_v12 = vld [vmem:[#allocation8 + $0x1c8] sm:$0xff] }
  0x4b   :  { %310 = vmatprep.subr.mxu1 %v84_v49  ;;  %234 = vmatpush1.msra.mxu0 %v151_v50  ;;  %v134_v13 = vld [vmem:[#allocation7 + $0x1c8] sm:$0xff]  ;;  %v201_v14 = vld [vmem:[#allocation8 + $0x1c0] sm:$0xff]  ;;  %v200_v16 = vld [vmem:[#allocation8 + $0x1b8] sm:$0xff] }
  0x4c   :  { %311 = vmatpush1.msra.mxu1 %v83_v51  ;;  %235 = vmatprep.subr.mxu0 %v150_v52  ;;  %v133_v15 = vld [vmem:[#allocation7 + $0x1c0] sm:$0xff]  ;;  %v132_v17 = vld [vmem:[#allocation7 + $0x1b8] sm:$0xff]  ;;  %v199_v18 = vld [vmem:[#allocation8 + $0x1b0] sm:$0xff] }
  0x4d   :  { %312 = vmatprep.subr.mxu1 %v82_v53  ;;  %236 = vmatpush1.msra.mxu0 %v149_v54  ;;  %v131_v19 = vld [vmem:[#allocation7 + $0x1b0] sm:$0xff]  ;;  %v198_v20 = vld [vmem:[#allocation8 + $0x1a8] sm:$0xff]  ;;  %v197_v22 = vld [vmem:[#allocation8 + $0x1a0] sm:$0xff] }
  0x4e   :  { %313 = vmatpush1.msra.mxu1 %v81_v55  ;;  %237 = vmatprep.subr.mxu0 %v148_v56  ;;  %v130_v21 = vld [vmem:[#allocation7 + $0x1a8] sm:$0xff]  ;;  %v129_v23 = vld [vmem:[#allocation7 + $0x1a0] sm:$0xff]  ;;  %v196_v24 = vld [vmem:[#allocation8 + $0x198] sm:$0xff] }
  0x4f   :  { %314 = vmatprep.subr.mxu1 %v80_v57  ;;  %238 = vmatpush1.msra.mxu0 %v147_v58  ;;  %v128_v25 = vld [vmem:[#allocation7 + $0x198] sm:$0xff]  ;;  %v195_v26 = vld [vmem:[#allocation8 + $0x190] sm:$0xff]  ;;  %v194_v28 = vld [vmem:[#allocation8 + $0x188] sm:$0xff] }
  0x50   :  { %315 = vmatpush1.msra.mxu1 %v79_v59  ;;  %239 = vmatprep.subr.mxu0 %v146_v60  ;;  %v127_v27 = vld [vmem:[#allocation7 + $0x190] sm:$0xff]  ;;  %v126_v29 = vld [vmem:[#allocation7 + $0x188] sm:$0xff]  ;;  %v193_v30 = vld [vmem:[#allocation8 + $0x180] sm:$0xff] }
  0x51   :  { %316 = vmatprep.subr.mxu1 %v78_v61  ;;  %240 = vmatpush1.msra.mxu0 %v145_v62  ;;  %v125_v31 = vld [vmem:[#allocation7 + $0x180] sm:$0xff]  ;;  %v192_v32 = vld [vmem:[#allocation8 + $0x178] sm:$0xff]  ;;  %v191_v34 = vld [vmem:[#allocation8 + $0x170] sm:$0xff] }
  0x52   :  { %317 = vmatpush1.msra.mxu1 %v77_v63  ;;  %241 = vmatprep.subr.mxu0 %v208_v0  ;;  %v124_v33 = vld [vmem:[#allocation7 + $0x178] sm:$0xff]  ;;  %v123_v35 = vld [vmem:[#allocation7 + $0x170] sm:$0xff]  ;;  %v190_v36 = vld [vmem:[#allocation8 + $0x168] sm:$0xff] }
  0x53   :  { %318 = vmatprep.subr.mxu1 %v140_v1  ;;  %242 = vmatpush2.msra.mxu0 %v207_v2  ;;  %v122_v37 = vld [vmem:[#allocation7 + $0x168] sm:$0xff]  ;;  %v189_v38 = vld [vmem:[#allocation8 + $0x160] sm:$0xff]  ;;  %v188_v40 = vld [vmem:[#allocation8 + $0x158] sm:$0xff] }
  0x54   :  { %319 = vmatpush2.msra.mxu1 %v139_v3  ;;  %243 = vmatprep.subr.mxu0 %v206_v4  ;;  %v121_v39 = vld [vmem:[#allocation7 + $0x160] sm:$0xff]  ;;  %v120_v41 = vld [vmem:[#allocation7 + $0x158] sm:$0xff]  ;;  %v187_v42 = vld [vmem:[#allocation8 + $0x150] sm:$0xff] }
  0x55   :  { %320 = vmatprep.subr.mxu1 %v138_v5  ;;  %244 = vmatpush2.msra.mxu0 %v205_v6  ;;  %v119_v43 = vld [vmem:[#allocation7 + $0x150] sm:$0xff]  ;;  %v186_v44 = vld [vmem:[#allocation8 + $0x148] sm:$0xff]  ;;  %v185_v46 = vld [vmem:[#allocation8 + $0x140] sm:$0xff] }
  0x56   :  { %321 = vmatpush2.msra.mxu1 %v137_v7  ;;  %245 = vmatprep.subr.mxu0 %v204_v8  ;;  %v118_v45 = vld [vmem:[#allocation7 + $0x148] sm:$0xff]  ;;  %v117_v47 = vld [vmem:[#allocation7 + $0x140] sm:$0xff]  ;;  %v184_v48 = vld [vmem:[#allocation8 + $0x138] sm:$0xff] }
  0x57   :  { %322 = vmatprep.subr.mxu1 %v136_v9  ;;  %246 = vmatpush2.msra.mxu0 %v203_v10  ;;  %v116_v49 = vld [vmem:[#allocation7 + $0x138] sm:$0xff]  ;;  %v183_v50 = vld [vmem:[#allocation8 + $0x130] sm:$0xff]  ;;  %v182_v52 = vld [vmem:[#allocation8 + $0x128] sm:$0xff] }
  0x58   :  { %323 = vmatpush2.msra.mxu1 %v135_v11  ;;  %247 = vmatprep.subr.mxu0 %v202_v12  ;;  %v115_v51 = vld [vmem:[#allocation7 + $0x130] sm:$0xff]  ;;  %v114_v53 = vld [vmem:[#allocation7 + $0x128] sm:$0xff]  ;;  %v181_v54 = vld [vmem:[#allocation8 + $0x120] sm:$0xff] }
  0x59   :  { %324 = vmatprep.subr.mxu1 %v134_v13  ;;  %248 = vmatpush2.msra.mxu0 %v201_v14  ;;  %v113_v55 = vld [vmem:[#allocation7 + $0x120] sm:$0xff]  ;;  %v180_v56 = vld [vmem:[#allocation8 + $0x118] sm:$0xff]  ;;  %v179_v58 = vld [vmem:[#allocation8 + $0x110] sm:$0xff] }
  0x5a   :  { %325 = vmatpush2.msra.mxu1 %v133_v15  ;;  %249 = vmatprep.subr.mxu0 %v200_v16  ;;  %v112_v57 = vld [vmem:[#allocation7 + $0x118] sm:$0xff]  ;;  %v111_v59 = vld [vmem:[#allocation7 + $0x110] sm:$0xff]  ;;  %v178_v60 = vld [vmem:[#allocation8 + $0x108] sm:$0xff] }
  0x5b   :  { %326 = vmatprep.subr.mxu1 %v132_v17  ;;  %250 = vmatpush2.msra.mxu0 %v199_v18  ;;  %v110_v61 = vld [vmem:[#allocation7 + $0x108] sm:$0xff]  ;;  %v177_v62 = vld [vmem:[#allocation8 + $0x100] sm:$0xff]  ;;  %v144_v4 = vld [vmem:[#allocation5 + $0x18] sm:$0xff] }
  0x5c   :  { %327 = vmatpush2.msra.mxu1 %v131_v19  ;;  %251 = vmatprep.subr.mxu0 %v198_v20  ;;  %v142_v63 = vld [vmem:[#allocation5 + $0x8] sm:$0xff]  ;;  %v109_v0 = vld [vmem:[#allocation7 + $0x100] sm:$0xff]  ;;  %v76_v5 = vld [vmem:[#allocation2 + $0x18] sm:$0xff] }
  0x5d   :  { %328 = vmatprep.subr.mxu1 %v130_v21  ;;  %252 = vmatpush2.msra.mxu0 %v197_v22  ;;  %v74_v1 = vld [vmem:[#allocation2 + $0x8] sm:$0xff]  ;;  %v141_v2 = vld [vmem:[#allocation5] sm:$0xff]  ;;  %v143_v6 = vld [vmem:[#allocation5 + $0x10] sm:$0xff] }
  0x5e   :  { %329 = vmatpush2.msra.mxu1 %v129_v23  ;;  %253 = vmatprep.subr.mxu0 %v196_v24  ;;  %v73_v3 = vld [vmem:[#allocation2] sm:$0xff]  ;;  %v75_v7 = vld [vmem:[#allocation2 + $0x10] sm:$0xff] }
  0x5f   :  { %330 = vmatprep.subr.mxu1 %v128_v25  ;;  %254 = vmatpush2.msra.mxu0 %v195_v26 }
  0x60   :  { %331 = vmatpush2.msra.mxu1 %v127_v27  ;;  %255 = vmatprep.subr.mxu0 %v194_v28 }
  0x61   :  { %332 = vmatprep.subr.mxu1 %v126_v29  ;;  %256 = vmatpush2.msra.mxu0 %v193_v30 }
  0x62   :  { %333 = vmatpush2.msra.mxu1 %v125_v31  ;;  %257 = vmatprep.subr.mxu0 %v192_v32 }
  0x63   :  { %334 = vmatprep.subr.mxu1 %v124_v33  ;;  %258 = vmatpush2.msra.mxu0 %v191_v34 }
  0x64   :  { %335 = vmatpush2.msra.mxu1 %v123_v35  ;;  %259 = vmatprep.subr.mxu0 %v190_v36 }
  0x65   :  { %336 = vmatprep.subr.mxu1 %v122_v37  ;;  %260 = vmatpush2.msra.mxu0 %v189_v38 }
  0x66   :  { %337 = vmatpush2.msra.mxu1 %v121_v39  ;;  %261 = vmatprep.subr.mxu0 %v188_v40 }
  0x67   :  { %338 = vmatprep.subr.mxu1 %v120_v41  ;;  %262 = vmatpush2.msra.mxu0 %v187_v42 }
  0x68   :  { %339 = vmatpush2.msra.mxu1 %v119_v43  ;;  %263 = vmatprep.subr.mxu0 %v186_v44 }
  0x69   :  { %340 = vmatprep.subr.mxu1 %v118_v45  ;;  %264 = vmatpush2.msra.mxu0 %v185_v46 }
  0x6a   :  { %341 = vmatpush2.msra.mxu1 %v117_v47  ;;  %265 = vmatprep.subr.mxu0 %v184_v48 }
  0x6b   :  { %342 = vmatprep.subr.mxu1 %v116_v49  ;;  %266 = vmatpush2.msra.mxu0 %v183_v50 }
  0x6c   :  { %343 = vmatpush2.msra.mxu1 %v115_v51  ;;  %267 = vmatprep.subr.mxu0 %v182_v52 }
  0x6d   :  { %344 = vmatprep.subr.mxu1 %v114_v53  ;;  %268 = vmatpush2.msra.mxu0 %v181_v54 }
  0x6e   :  { %345 = vmatpush2.msra.mxu1 %v113_v55  ;;  %269 = vmatprep.subr.mxu0 %v180_v56 }
  0x6f   :  { %346 = vmatprep.subr.mxu1 %v112_v57  ;;  %270 = vmatpush2.msra.mxu0 %v179_v58 }
  0x70   :  { %347 = vmatpush2.msra.mxu1 %v111_v59  ;;  %271 = vmatprep.subr.mxu0 %v178_v60 }
  0x71   :  { %348 = vmatprep.subr.mxu1 %v110_v61  ;;  %272 = vmatpush2.msra.mxu0 %v177_v62 }
  0x72   :  { %273 = vmatprep.mubr.f32.mxu0 %v142_v63  ;;  %349 = vmatpush2.msra.mxu1 %v109_v0 }
  0x73   :  { %350 = vmatprep.mubr.f32.mxu1 %v74_v1  ;;  %274 = vmatmul.mubr.f32.vlgmr.msra.gmra.mxu0 %v141_v2 }
  0x74   :  { %351 = vmatmul.mubr.f32.vlgmr.msra.gmra.mxu1 %v73_v3  ;;  %279 = vmatprep.mubr.f32.mxu0 %v144_v4 }
  0x75   :  { %356 = vmatprep.mubr.f32.mxu1 %v76_v5 }
  0x77   :  { %280 = vmatmul.mubr.f32.gmra.mxu0 %v143_v6 }
  0x78   :  { %357 = vmatmul.mubr.f32.gmra.mxu1 %v75_v7 }
 0x133   :  { %v275_v8 = vpop.f32.mrf.mxu0 }
 0x134   :  { %v352_v9 = vpop.f32.mrf.mxu1 }
 0x135   :  { %v353_v10 = vadd.f32 %v352_v9, %v275_v8  ;;  %v277_v11 = vpop.f32.mrf.mxu0 }
 0x136   :  { %v354_v12 = vpop.f32.mrf.mxu1 }
 0x137   :  { %v363_v13 = vadd.f32 %v353_v10, %v73_v3  ;;  %v355_v14 = vadd.f32 %v354_v12, %v277_v11  ;;  %v281_v15 = vpop.f32.mrf.mxu0 }
 0x138   :  { %v358_v16 = vpop.f32.mrf.mxu1 }
 0x139   :  { %367 = vst [vmem:[#allocation10] sm:$0xff] %v363_v13  ;;  %v364_v17 = vadd.f32 %v355_v14, %v74_v1  ;;  %v359_v18 = vadd.f32 %v358_v16, %v281_v15  ;;  %v283_v19 = vpop.f32.mrf.mxu0 }
 0x13a   :  { %v360_v20 = vpop.f32.mrf.mxu1 }
 0x13b   :  { %368 = vst [vmem:[#allocation10 + $0x8] sm:$0xff] %v364_v17  ;;  %v365_v21 = vadd.f32 %v359_v18, %v75_v7  ;;  %v361_v22 = vadd.f32 %v360_v20, %v283_v19 }
 0x13d   :  { %369 = vst [vmem:[#allocation10 + $0x10] sm:$0xff] %v365_v21  ;;  %v366_v23 = vadd.f32 %v361_v22, %v76_v5 }
 0x13f   :  { %370 = vst [vmem:[#allocation10 + $0x18] sm:$0xff] %v366_v23 }
 0x140   :  { %488 = shalt.err (!%p485_p10)
}
 0x141   :  { %382 = dma.vmem_to_hbm [thread:$0]  %s377_s3, 512, %s571_s4, [#allocation4], %s507_s20, %s507_s20, %s508_s21  }
 0x142   :  { %503 = dma.done.wait [#allocation4], 512  }
 0x143   :  { %504 = vsyncadd [#allocation4], 4294966784 }
 0x144   :  { %386 = vsyncpa [#allocation3], 1 }
 0x145   :  { %387 = vsyncpa [#allocation6], 1 }
 0x146   :  { %388 = vsyncpa [#allocation9], 1 }
 0x147   :  { %389 = vsyncpa [#allocation4], 1 }

</bundles_post_ra>
